<compile_context>
chip_gen: v5e
topology: v5e:2x2
jax: 0.10.0
libtpu: 0.0.40
codegen_flags: <defaults>
</compile_context>

<pallas_src>
import functools

import jax
import jax.numpy as jnp
from jax.experimental import pallas as pl
from jax.experimental.pallas import tpu as pltpu

_LANES = 128                     # boxes live on the lane axis
_MAX_TILE_M = 2048               # rows of 128 boxes per grid step
_VMEM_LIMIT = 32 * 1024 * 1024   # explicit scoped-VMEM limit (safe v5e/v6e/v7x)


def _round_up(x, k):
    return ((x + k - 1) // k) * k


def _choose_tiling(m, sub):
    """Pick (tile_m, m_pad, grid) for m rows of 128 boxes.

    Largest tile that fits the VMEM budget, split into >=2 steps once there is
    enough work so the input DMA overlaps VPU compute and both v7x TensorCores
    get a step; more steps only when the tile cap forces it.
    """
    if m <= sub:
        tile_m = sub
    else:
        n_steps = max(2, -(-m // _MAX_TILE_M))
        tile_m = min(_MAX_TILE_M, _round_up(-(-m // n_steps), sub))
    m_pad = _round_up(m, tile_m)
    return tile_m, m_pad, m_pad // tile_m


def _compute_loss(p_ref, t_ref, loss_type):
    """Elementwise IoU / GIoU loss for one pair of (4, TILE_M, 128) blocks.

    Planes 0..3 = (cx, cy, w, h).  All intermediates are dense (TILE_M, 128)
    f32 planes -> full (8,128)-vreg VPU occupancy; math is always f32.
    """
    ld = lambda r, c: r[c].astype(jnp.float32)
    px, py, pw, ph = ld(p_ref, 0), ld(p_ref, 1), ld(p_ref, 2), ld(p_ref, 3)
    tx, ty, tw, th = ld(t_ref, 0), ld(t_ref, 1), ld(t_ref, 2), ld(t_ref, 3)

    # half-sizes computed once and reused by both iou and giou corner math
    pw2, ph2 = pw * 0.5, ph * 0.5
    tw2, th2 = tw * 0.5, th * 0.5
    p_x0, p_x1 = px - pw2, px + pw2
    p_y0, p_y1 = py - ph2, py + ph2
    t_x0, t_x1 = tx - tw2, tx + tw2
    t_y0, t_y1 = ty - th2, ty + th2

    tl_x = jnp.maximum(p_x0, t_x0)
    tl_y = jnp.maximum(p_y0, t_y0)
    br_x = jnp.minimum(p_x1, t_x1)
    br_y = jnp.minimum(p_y1, t_y1)

    area_p = pw * ph
    area_g = tw * th
    inter = jnp.logical_and(tl_x < br_x, tl_y < br_y)
    area_i = jnp.where(inter, (br_x - tl_x) * (br_y - tl_y), 0.0)
    area_u = area_p + area_g - area_i
    iou = area_i / (area_u + 1e-16)

    if loss_type == "iou":
        return 1.0 - iou * iou
    elif loss_type == "giou":
        c_x0 = jnp.minimum(p_x0, t_x0)
        c_y0 = jnp.minimum(p_y0, t_y0)
        c_x1 = jnp.maximum(p_x1, t_x1)
        c_y1 = jnp.maximum(p_y1, t_y1)
        c_en = jnp.logical_and(c_x0 < c_x1, c_y0 < c_y1)
        area_c = jnp.where(c_en, (c_x1 - c_x0) * (c_y1 - c_y0), 0.0)
        giou = iou - (area_c - area_u) / jnp.maximum(area_c, 1e-16)
        return 1.0 - jnp.clip(giou, -1.0, 1.0)
    raise AttributeError(f"unsupported iou loss type: {loss_type}")


def _iou_loss_map_kernel(p_ref, t_ref, o_ref, *, loss_type):
    # reduction='none': write the dense (TILE_M, 128) loss slab.
    o_ref[...] = _compute_loss(p_ref, t_ref, loss_type).astype(o_ref.dtype)


def _iou_loss_reduce_kernel(p_ref, t_ref, o_ref, *, loss_type):
    # reduction='mean'/'sum': accumulate an (8, 128) partial sum in the
    # resident output block across grid steps.  Padded lanes hold identity
    # boxes (loss == 0), so no mask is needed.
    loss = _compute_loss(p_ref, t_ref, loss_type)                # (tile_m, 128)

    @pl.when(pl.program_id(0) == 0)
    def _():
        o_ref[...] = jnp.zeros_like(o_ref)

    # fold tile_m rows onto 8 sublanes; reshape is vreg-tile aligned (free).
    o_ref[...] += jnp.sum(loss.reshape(-1, 8, _LANES), axis=0)


@functools.partial(jax.jit, static_argnames=("reduction", "loss_type", "pad_output"))
def iou_loss(pred, target, reduction="none", loss_type="iou", pad_output=False):
    """Pallas implementation of YOLOX IOUloss.forward."""
    if loss_type not in ("iou", "giou"):
        raise AttributeError(f"unsupported iou loss type: {loss_type}")
    assert pred.shape[0] == target.shape[0]
    pred = jnp.reshape(pred, (-1, 4))
    target = jnp.reshape(target, (-1, 4))

    # bf16 inputs are streamed as bf16 (half the HBM read) and upcast in-kernel;
    # everything else is promoted to f32.  Loss math is always f32.
    in_dtype = pred.dtype if pred.dtype in (jnp.float32, jnp.bfloat16) else jnp.float32
    pred = pred.astype(in_dtype)
    target = target.astype(in_dtype)

    n = pred.shape[0]
    m = -(-n // _LANES)                                  # rows of 128 boxes
    sub = 16 if in_dtype == jnp.bfloat16 else 8          # sublane packing unit
    tile_m, m_pad, grid = _choose_tiling(m, sub)
    n_pad = m_pad * _LANES

    def to_planar(x):
        # One fused pad+transpose pass per input (no concat).  Padding value
        # 1.0 makes padded boxes identical (cx=cy=w=h=1) for pred and target,
        # so their iou/giou loss is exactly 0.
        x = jnp.pad(x, ((0, n_pad - n), (0, 0)), constant_values=1.0)
        return x.T.reshape(4, m_pad, _LANES)

    pred_pl = to_planar(pred)
    target_pl = to_planar(target)

    in_specs = [pl.BlockSpec((4, tile_m, _LANES), lambda i: (0, i, 0)),
                pl.BlockSpec((4, tile_m, _LANES), lambda i: (0, i, 0))]

    if reduction in ("mean", "sum"):
        kernel = functools.partial(_iou_loss_reduce_kernel, loss_type=loss_type)
        # Resident (8,128) accumulator -> grid axis must be "arbitrary"
        # (single-core on v7x for this path; accepted trade-off).
        partial = pl.pallas_call(
            kernel,
            out_shape=jax.ShapeDtypeStruct((8, _LANES), jnp.float32),
            grid=(grid,),
            in_specs=in_specs,
            out_specs=pl.BlockSpec((8, _LANES), lambda i: (0, 0)),
            compiler_params=pltpu.CompilerParams(
                dimension_semantics=("arbitrary",),
                vmem_limit_bytes=_VMEM_LIMIT),
        )(pred_pl, target_pl)
        total = jnp.sum(partial)                          # 1024-element finish
        total = total / n if reduction == "mean" else total
        return total.astype(in_dtype)

    kernel = functools.partial(_iou_loss_map_kernel, loss_type=loss_type)
    loss = pl.pallas_call(
        kernel,
        out_shape=jax.ShapeDtypeStruct((m_pad, _LANES), in_dtype),
        grid=(grid,),
        in_specs=in_specs,
        out_specs=pl.BlockSpec((tile_m, _LANES), lambda i: (i, 0)),
        compiler_params=pltpu.CompilerParams(
            dimension_semantics=("parallel",),
            vmem_limit_bytes=_VMEM_LIMIT),
    )(pred_pl, target_pl)
    loss = loss.reshape(n_pad)
    if pad_output:
        return loss          # padded entries are exactly 0
    # TODO(synk): slicing to (n,) materializes a tail copy when n isn't
    # tile-aligned; callers that tolerate padding should pass pad_output=True.
    return loss[:n]


def _iou_loss_ref(pred, target, reduction="none", loss_type="iou"):
    """Pure-JAX reference mirroring the PyTorch code."""
    pred = jnp.reshape(pred, (-1, 4)).astype(jnp.float32)
    target = jnp.reshape(target, (-1, 4)).astype(jnp.float32)
    tl = jnp.maximum(pred[:, :2] - pred[:, 2:] / 2,
                     target[:, :2] - target[:, 2:] / 2)
    br = jnp.minimum(pred[:, :2] + pred[:, 2:] / 2,
                     target[:, :2] + target[:, 2:] / 2)
    area_p = jnp.prod(pred[:, 2:], axis=-1)
    area_g = jnp.prod(target[:, 2:], axis=-1)
    en = jnp.prod((tl < br).astype(jnp.float32), axis=-1)
    area_i = jnp.prod(br - tl, axis=-1) * en
    area_u = area_p + area_g - area_i
    iou = area_i / (area_u + 1e-16)
    if loss_type == "iou":
        loss = 1 - iou ** 2
    else:
        c_tl = jnp.minimum(pred[:, :2] - pred[:, 2:] / 2,
                           target[:, :2] - target[:, 2:] / 2)
        c_br = jnp.maximum(pred[:, :2] + pred[:, 2:] / 2,
                           target[:, :2] + target[:, 2:] / 2)
        c_en = jnp.prod((c_tl < c_br).astype(jnp.float32), axis=-1)
        area_c = jnp.prod(c_br - c_tl, axis=-1) * c_en
        giou = iou - (area_c - area_u) / jnp.maximum(area_c, 1e-16)
        loss = 1 - jnp.clip(giou, -1.0, 1.0)
    if reduction == "mean":
        loss = jnp.mean(loss)
    elif reduction == "sum":
        loss = jnp.sum(loss)
    return loss


if __name__ == "__main__":
    key = jax.random.PRNGKey(0)
    ks = jax.random.split(key, 8)

    def make_boxes(kc, ksz, n):
        # cxcywh boxes: centers in [0, 10), sizes in [1, 5)
        return jnp.concatenate([
            jax.random.uniform(kc, (n, 2), jnp.float32) * 10.0,
            jax.random.uniform(ksz, (n, 2), jnp.float32) * 4.0 + 1.0,
        ], axis=-1)

    # default module config: reduction='none', loss_type='iou' (small N)
    n_small = 16
    pred_s = make_boxes(ks[0], ks[1], n_small)
    target_s = make_boxes(ks[2], ks[3], n_small)
    out = jax.block_until_ready(
        iou_loss(pred_s, target_s, reduction="none", loss_type="iou"))
    ref = _iou_loss_ref(pred_s, target_s, reduction="none", loss_type="iou")
    assert out.shape == (n_small,)
    assert jnp.allclose(out, ref, atol=1e-5, rtol=1e-5)

    # giou path + in-kernel mean reduction (identity-box padding -> exact)
    out_g = jax.block_until_ready(
        iou_loss(pred_s, target_s, reduction="mean", loss_type="giou"))
    ref_g = _iou_loss_ref(pred_s, target_s, reduction="mean", loss_type="giou")
    assert jnp.allclose(out_g, ref_g, atol=1e-5, rtol=1e-5)

    # multi-grid-step case: exercises grid > 1 and identity-box padding
    n_big = 1200
    pred_b = make_boxes(ks[4], ks[5], n_big)
    target_b = make_boxes(ks[6], ks[7], n_big)
    out_bn = jax.block_until_ready(
        iou_loss(pred_b, target_b, reduction="none", loss_type="iou"))
    ref_bn = _iou_loss_ref(pred_b, target_b, reduction="none", loss_type="iou")
    assert out_bn.shape == (n_big,)
    assert jnp.allclose(out_bn, ref_bn, atol=1e-5, rtol=1e-5)

    out_bs = jax.block_until_ready(
        iou_loss(pred_b, target_b, reduction="sum", loss_type="giou"))
    ref_bs = _iou_loss_ref(pred_b, target_b, reduction="sum", loss_type="giou")
    assert jnp.allclose(out_bs, ref_bs, atol=1e-3, rtol=1e-5)

    print("KERNEL_OK")
</pallas_src>

<mosaic_0001>
module attributes {stable_mosaic.version = 11 : i64} {
  func.func @_iou_loss_map_kernel(%arg0: i32, %arg1: memref<4x8x128xf32, #tpu.memory_space<vmem>>, %arg2: memref<4x8x128xf32, #tpu.memory_space<vmem>>, %arg3: memref<8x128xf32, #tpu.memory_space<vmem>>) attributes {dimension_semantics = [#tpu.dimension_semantics<parallel>], iteration_bounds = array<i64: 1>, scalar_prefetch = 0 : i64, scratch_operands = 0 : i64, tpu.core_type = #tpu.core_type<tc>, window_params = [{transform_indices = @transform_0, window_bounds = array<i64: 4, 8, 128>}, {transform_indices = @transform_1, window_bounds = array<i64: 4, 8, 128>}, {transform_indices = @transform_2, window_bounds = array<i64: 8, 128>}]} {
    %c0 = arith.constant 0 : index
    %c0_0 = arith.constant 0 : index
    %c0_1 = arith.constant 0 : index
    %0 = vector.load %arg1[%c0, %c0_0, %c0_1] : memref<4x8x128xf32, #tpu.memory_space<vmem>>, vector<1x8x128xf32>
    %1 = vector.shape_cast %0 : vector<1x8x128xf32> to vector<8x128xf32>
    %c1 = arith.constant 1 : index
    %c0_2 = arith.constant 0 : index
    %c0_3 = arith.constant 0 : index
    %2 = vector.load %arg1[%c1, %c0_2, %c0_3] : memref<4x8x128xf32, #tpu.memory_space<vmem>>, vector<1x8x128xf32>
    %3 = vector.shape_cast %2 : vector<1x8x128xf32> to vector<8x128xf32>
    %c2 = arith.constant 2 : index
    %c0_4 = arith.constant 0 : index
    %c0_5 = arith.constant 0 : index
    %4 = vector.load %arg1[%c2, %c0_4, %c0_5] : memref<4x8x128xf32, #tpu.memory_space<vmem>>, vector<1x8x128xf32>
    %5 = vector.shape_cast %4 : vector<1x8x128xf32> to vector<8x128xf32>
    %c3 = arith.constant 3 : index
    %c0_6 = arith.constant 0 : index
    %c0_7 = arith.constant 0 : index
    %6 = vector.load %arg1[%c3, %c0_6, %c0_7] : memref<4x8x128xf32, #tpu.memory_space<vmem>>, vector<1x8x128xf32>
    %7 = vector.shape_cast %6 : vector<1x8x128xf32> to vector<8x128xf32>
    %c0_8 = arith.constant 0 : index
    %c0_9 = arith.constant 0 : index
    %c0_10 = arith.constant 0 : index
    %8 = vector.load %arg2[%c0_8, %c0_9, %c0_10] : memref<4x8x128xf32, #tpu.memory_space<vmem>>, vector<1x8x128xf32>
    %9 = vector.shape_cast %8 : vector<1x8x128xf32> to vector<8x128xf32>
    %c1_11 = arith.constant 1 : index
    %c0_12 = arith.constant 0 : index
    %c0_13 = arith.constant 0 : index
    %10 = vector.load %arg2[%c1_11, %c0_12, %c0_13] : memref<4x8x128xf32, #tpu.memory_space<vmem>>, vector<1x8x128xf32>
    %11 = vector.shape_cast %10 : vector<1x8x128xf32> to vector<8x128xf32>
    %c2_14 = arith.constant 2 : index
    %c0_15 = arith.constant 0 : index
    %c0_16 = arith.constant 0 : index
    %12 = vector.load %arg2[%c2_14, %c0_15, %c0_16] : memref<4x8x128xf32, #tpu.memory_space<vmem>>, vector<1x8x128xf32>
    %13 = vector.shape_cast %12 : vector<1x8x128xf32> to vector<8x128xf32>
    %c3_17 = arith.constant 3 : index
    %c0_18 = arith.constant 0 : index
    %c0_19 = arith.constant 0 : index
    %14 = vector.load %arg2[%c3_17, %c0_18, %c0_19] : memref<4x8x128xf32, #tpu.memory_space<vmem>>, vector<1x8x128xf32>
    %15 = vector.shape_cast %14 : vector<1x8x128xf32> to vector<8x128xf32>
    %cst = arith.constant 5.000000e-01 : f32
    %16 = vector.broadcast %cst : f32 to vector<8x128xf32>
    %17 = arith.mulf %5, %16 : vector<8x128xf32>
    %cst_20 = arith.constant 5.000000e-01 : f32
    %18 = vector.broadcast %cst_20 : f32 to vector<8x128xf32>
    %19 = arith.mulf %7, %18 : vector<8x128xf32>
    %cst_21 = arith.constant 5.000000e-01 : f32
    %20 = vector.broadcast %cst_21 : f32 to vector<8x128xf32>
    %21 = arith.mulf %13, %20 : vector<8x128xf32>
    %cst_22 = arith.constant 5.000000e-01 : f32
    %22 = vector.broadcast %cst_22 : f32 to vector<8x128xf32>
    %23 = arith.mulf %15, %22 : vector<8x128xf32>
    %24 = arith.subf %1, %17 : vector<8x128xf32>
    %25 = arith.addf %1, %17 : vector<8x128xf32>
    %26 = arith.subf %3, %19 : vector<8x128xf32>
    %27 = arith.addf %3, %19 : vector<8x128xf32>
    %28 = arith.subf %9, %21 : vector<8x128xf32>
    %29 = arith.addf %9, %21 : vector<8x128xf32>
    %30 = arith.subf %11, %23 : vector<8x128xf32>
    %31 = arith.addf %11, %23 : vector<8x128xf32>
    %32 = arith.maximumf %24, %28 : vector<8x128xf32>
    %33 = arith.maximumf %26, %30 : vector<8x128xf32>
    %34 = arith.minimumf %25, %29 : vector<8x128xf32>
    %35 = arith.minimumf %27, %31 : vector<8x128xf32>
    %36 = arith.mulf %5, %7 : vector<8x128xf32>
    %37 = arith.mulf %13, %15 : vector<8x128xf32>
    %38 = arith.cmpf olt, %32, %34 : vector<8x128xf32>
    %39 = arith.cmpf olt, %33, %35 : vector<8x128xf32>
    %40 = arith.andi %38, %39 : vector<8x128xi1>
    %41 = arith.subf %34, %32 : vector<8x128xf32>
    %42 = arith.subf %35, %33 : vector<8x128xf32>
    %43 = arith.mulf %41, %42 : vector<8x128xf32>
    %cst_23 = arith.constant 0.000000e+00 : f32
    %44 = vector.broadcast %cst_23 : f32 to vector<8x128xf32>
    %45 = arith.select %40, %43, %44 : vector<8x128xi1>, vector<8x128xf32>
    %46 = arith.addf %36, %37 : vector<8x128xf32>
    %47 = arith.subf %46, %45 : vector<8x128xf32>
    %cst_24 = arith.constant 1.000000e-16 : f32
    %48 = vector.broadcast %cst_24 : f32 to vector<8x128xf32>
    %49 = arith.addf %47, %48 : vector<8x128xf32>
    %50 = arith.divf %45, %49 : vector<8x128xf32>
    %51 = arith.mulf %50, %50 : vector<8x128xf32>
    %cst_25 = arith.constant 1.000000e+00 : f32
    %52 = vector.broadcast %cst_25 : f32 to vector<8x128xf32>
    %53 = arith.subf %52, %51 : vector<8x128xf32>
    %c0_26 = arith.constant 0 : index
    %c0_27 = arith.constant 0 : index
    %54 = vector.load %arg3[%c0_26, %c0_27] : memref<8x128xf32, #tpu.memory_space<vmem>>, vector<8x128xf32>
    tpu.vector_store %arg3[%c0_26, %c0_27], %53 {strides = array<i32>} : memref<8x128xf32, #tpu.memory_space<vmem>>, vector<8x128xf32>,
    return
  }
  func.func @transform_0(%arg0: i32) -> (i32, i32, i32) {
    %c0_i32 = arith.constant 0 : i32
    %c0_i32_0 = arith.constant 0 : i32
    %c0_i32_1 = arith.constant 0 : i32
    return %c0_i32, %arg0, %c0_i32_0 : i32, i32, i32
  }
  func.func @transform_1(%arg0: i32) -> (i32, i32, i32) {
    %c0_i32 = arith.constant 0 : i32
    %c0_i32_0 = arith.constant 0 : i32
    %c0_i32_1 = arith.constant 0 : i32
    return %c0_i32, %arg0, %c0_i32_0 : i32, i32, i32
  }
  func.func @transform_2(%arg0: i32) -> (i32, i32) {
    %c0_i32 = arith.constant 0 : i32
    %c0_i32_0 = arith.constant 0 : i32
    return %arg0, %c0_i32 : i32, i32
  }
}

</mosaic_0001>

<bundles_post_ra>
// kernel: iou_loss.1
= control target key start
LH: loop header
LB: loop body
LE: loop exit
PB: predicated region body
PF: predicated region fallthrough
CT: control target
= control target key end

     0   :  { %s125_s0 = inlined_call_operand.vmem [shape: f32[4,8,128], index: 0, kind: input, shape index: {}]   ;;  %s126_s1 = inlined_call_operand.vmem [shape: f32[4,8,128], index: 1, kind: input, shape index: {}]   ;;  %s127_s2 = inlined_call_operand.vmem [shape: f32[8,128], index: 2, kind: output, shape index: {}]  }
   0x1   :  { %v11_v0 = vld [vmem:[%s125_s0] sm:$0xff]  ;;  %v76_v1 = vld [vmem:[%s125_s0 + $0x10] sm:$0xff]  ;;  %v75_v2 = vld [vmem:[%s125_s0 + $0x8] sm:$0xff] }
   0x2   :  { %v77_v3 = vld [vmem:[%s125_s0 + $0x18] sm:$0xff]  ;;  %v18_v4 = vld [vmem:[%s126_s1] sm:$0xff]  ;;  %v25_v5 = vmul.f32 0.5, %v76_v1  ;;  %v78_v6 = vld [vmem:[%s126_s1 + $0x8] sm:$0xff] }
   0x3   :  { %v79_v7 = vld [vmem:[%s126_s1 + $0x10] sm:$0xff]  ;;  %v80_v8 = vld [vmem:[%s126_s1 + $0x18] sm:$0xff]  ;;  %v26_v9 = vmul.f32 0.5, %v77_v3  ;;  %v41_v20 = vmul.f32 %v77_v3, %v76_v1 }
   0x4   :  { %v27_v10 = vmul.f32 0.5, %v79_v7  ;;  %v28_v11 = vmul.f32 0.5, %v80_v8  ;;  %v29_v12 = vsub.f32 %v11_v0, %v25_v5  ;;  %v30_v13 = vadd.f32 %v25_v5, %v11_v0 }
   0x5   :  { %v31_v14 = vsub.f32 %v75_v2, %v26_v9  ;;  %v32_v15 = vadd.f32 %v75_v2, %v26_v9  ;;  %v42_v21 = vmul.f32 %v80_v8, %v79_v7 }
   0x6   :  { %v33_v16 = vsub.f32 %v18_v4, %v27_v10  ;;  %v34_v17 = vadd.f32 %v27_v10, %v18_v4  ;;  %v35_v18 = vsub.f32 %v78_v6, %v28_v11  ;;  %v36_v19 = vadd.f32 %v78_v6, %v28_v11 }
   0x7   :  { %v50_v28 = vadd.f32 %v42_v21, %v41_v20 }
   0x8   :  { %v37_v22 = vmax.f32 %v29_v12, %v33_v16  ;;  %v38_v23 = vmax.f32 %v31_v14, %v35_v18  ;;  %v39_v24 = vmin.f32 %v30_v13, %v34_v17  ;;  %v40_v25 = vmin.f32 %v32_v15, %v36_v19 }
   0xa   :  { %vm43_vm0 = vcmp.lt.f32.partialorder %v37_v22, %v39_v24  ;;  %vm44_vm1 = vcmp.lt.f32.partialorder %v38_v23, %v40_v25  ;;  %v46_v26 = vsub.f32 %v39_v24, %v37_v22  ;;  %v47_v27 = vsub.f32 %v40_v25, %v38_v23 }
   0xb   :  { %vm45_vm2 = vmand %vm43_vm0, %vm44_vm1 }
   0xc   :  { %v48_v29 = vmul.f32 %v47_v27, %v46_v26 }
   0xe   :  { %v49_v30 = vsel %vm45_vm2, %v48_v29, 0.0 }
   0xf   :  { %v51_v31 = vsub.f32 %v50_v28, %v49_v30 }
  0x11   :  { %v52_v32 = vadd.f32 1e-16, %v51_v31 }
  0x13   :  { %81 = vrcp.f32 %v52_v32  ;;  %v64_v35 = vand.u32 2147483648, %v52_v32  ;;  %vm58_vm3 = vweird.f32 %v52_v32  ;;  %v62_v37 = vand.u32 2147483647, %v52_v32 }
  0x15   :  { %v65_v39 = vor.u32 1.1754944e-38, %v64_v35  ;;  %vm63_vm6 = vcmp.eq.f32.partialorder %v62_v37, 8.507059e+37 }
  0x19   :  { %v82_v33 = vpop.eup %81 }
  0x1a   :  { %v54_v34 = vmul.f32 %v82_v33, %v52_v32  ;;  %vm59_vm4 = vweird.f32 %v82_v33 }
  0x1b   :  { %vm60_vm5 = vmor %vm58_vm3, %vm59_vm4 }
  0x1c   :  { %v55_v36 = vsub.f32 1.0, %v54_v34 }
  0x1e   :  { %v56_v38 = vmul.f32 %v82_v33, %v55_v36 }
  0x20   :  { %v57_v40 = vadd.f32 %v82_v33, %v56_v38 }
  0x22   :  { %v61_v41 = vsel %vm60_vm5, %v82_v33, %v57_v40 }
  0x23   :  { %v66_v42 = vsel %vm63_vm6, %v65_v39, %v61_v41 }
  0x24   :  { %v67_v43 = vmul.f32 %v66_v42, %v49_v30 }
  0x26   :  { %v68_v44 = vmul.f32 %v67_v43, %v67_v43 }
  0x28   :  { %v69_v45 = vsub.f32 1.0, %v68_v44 }
  0x2a   :  { %70 = vst [vmem:[%s127_s2] sm:$0xff] %v69_v45 }

</bundles_post_ra>
